<compile_context>
chip_gen: v5e
topology: v5e:2x2
jax: 0.10.0
libtpu: 0.0.40
codegen_flags: <defaults>
</compile_context>

<pallas_src>
import jax
import jax.numpy as jnp
from jax.experimental import pallas as pl
from jax.experimental.pallas import tpu as pltpu

PACK = 16          # samples packed per row of the lane-dense layout
IN_F, HID_F, OUT_F = 7, 10, 1


def mood_predictor_kernel(x_ref, w1_ref, b1_ref, w2_ref, b2_ref, w3_ref, b3_ref, o_ref):
    # x tile: [tr, 112] lane-dense (16 samples per row), already in the layout
    # the MXU wants -- no transpose needed.
    x = x_ref[...].astype(jnp.float32)                                    # [tr, 112]

    # fc1 + ReLU (block-diag): [tr,112] @ [112,160] + [1,160] -> [tr,160]
    h1 = jnp.dot(x, w1_ref[...], preferred_element_type=jnp.float32) + b1_ref[...]
    h1 = jnp.maximum(h1, 0.0)

    # fc2 + ReLU: [tr,160] @ [160,160] + [1,160] -> [tr,160]
    h2 = jnp.dot(h1, w2_ref[...], preferred_element_type=jnp.float32) + b2_ref[...]
    h2 = jnp.maximum(h2, 0.0)

    # fc3: [tr,160] @ [160,16] + [1,16] -> [tr,16]  (16 samples' outputs per row)
    out = jnp.dot(h2, w3_ref[...], preferred_element_type=jnp.float32) + b3_ref[...]
    o_ref[...] = out.astype(o_ref.dtype)


def _block_diag(w, n):
    """w: [out, in] (PyTorch layout). Returns [n*in, n*out] with n copies of w.T
    on the block diagonal, so packed_x @ blk applies w to each packed sample."""
    out_f, in_f = w.shape
    eye = jnp.eye(n, dtype=w.dtype)
    return jnp.einsum("ij,oa->iajo", eye, w).reshape(n * in_f, n * out_f)


def pack_params(params):
    """Build the block-diagonal / tiled weights ONCE (kept VMEM-resident)."""
    w1b = _block_diag(params["w1"], PACK)                      # [112, 160]
    w2b = _block_diag(params["w2"], PACK)                      # [160, 160]
    w3b = _block_diag(params["w3"], PACK)                      # [160, 16]
    b1b = jnp.tile(params["b1"], PACK).reshape(1, PACK * HID_F)  # [1, 160]
    b2b = jnp.tile(params["b2"], PACK).reshape(1, PACK * HID_F)  # [1, 160]
    b3b = jnp.tile(params["b3"], PACK).reshape(1, PACK * OUT_F)  # [1, 16]
    return w1b, b1b, w2b, b2b, w3b, b3b


def mood_predictor(x, packed, *, max_tile_rows=4096):
    """x: [B, 7] float32 (bf16 also accepted).  packed: output of pack_params.
    Returns [B, 1] float32, same semantics as the PyTorch module."""
    w1b, b1b, w2b, b2b, w3b, b3b = packed
    B, F = x.shape
    assert F == IN_F, f"expected {IN_F} input features, got {F}"

    # Pad only up to the 16-sample pack (<= 15 rows), never to the tile size.
    b16 = ((B + PACK - 1) // PACK) * PACK
    if b16 != B:
        x = jnp.pad(x, ((0, b16 - B), (0, 0)))
    R = b16 // PACK
    xp = x.reshape(R, PACK * IN_F)          # metadata-only reshape, lane-dense rows

    # Row-tile: multiple of 8 sublanes, >=2 grid steps when possible (v7x dual
    # TC), capped so x/out double-buffers + intermediates fit VMEM comfortably.
    if R <= 16:
        tr = R                               # single block == full extent
    else:
        tr = min(max_tile_rows, ((R + 1) // 2 + 7) // 8 * 8)
    num_tiles = pl.cdiv(R, tr)               # last tile may be ragged (masked)

    flops = 2 * R * (PACK * IN_F * PACK * HID_F
                     + PACK * HID_F * PACK * HID_F
                     + PACK * HID_F * PACK * OUT_F)
    bytes_accessed = (xp.size * xp.dtype.itemsize
                      + R * PACK * OUT_F * 4
                      + sum(a.size * 4 for a in packed))

    resident = lambda a: pl.BlockSpec(a.shape, lambda i: (0, 0))

    out = pl.pallas_call(
        mood_predictor_kernel,
        out_shape=jax.ShapeDtypeStruct((R, PACK * OUT_F), jnp.float32),
        grid=(num_tiles,),
        in_specs=[
            pl.BlockSpec((tr, PACK * IN_F), lambda i: (i, 0)),   # x: streamed
            resident(w1b), resident(b1b),                        # weights/biases:
            resident(w2b), resident(b2b),                        # VMEM resident
            resident(w3b), resident(b3b),
        ],
        out_specs=pl.BlockSpec((tr, PACK * OUT_F), lambda i: (i, 0)),
        compiler_params=pltpu.CompilerParams(
            dimension_semantics=("parallel",),
            vmem_limit_bytes=32 * 1024 * 1024,
        ),
        cost_estimate=pl.CostEstimate(
            flops=flops, transcendentals=0, bytes_accessed=bytes_accessed),
    )(xp, w1b, b1b, w2b, b2b, w3b, b3b)

    # [R, 16] -> [b16, 1] (metadata reshape), drop the small pack padding.
    return out.reshape(b16, OUT_F)[:B]


def init_params(key):
    """Deterministic init matching nn.Linear (PyTorch layout: W [out,in], b [out])."""
    ks = jax.random.split(key, 6)

    def linear_init(kw, kb, fan_in, fan_out):
        bound = 1.0 / float(fan_in) ** 0.5
        w = jax.random.uniform(kw, (fan_out, fan_in), jnp.float32, -bound, bound)
        b = jax.random.uniform(kb, (fan_out,), jnp.float32, -bound, bound)
        return w, b

    w1, b1 = linear_init(ks[0], ks[1], IN_F, HID_F)
    w2, b2 = linear_init(ks[2], ks[3], HID_F, HID_F)
    w3, b3 = linear_init(ks[4], ks[5], HID_F, OUT_F)
    return {"w1": w1, "b1": b1, "w2": w2, "b2": b2, "w3": w3, "b3": b3}


def reference_forward(x, params):
    """Plain-JAX reference with identical semantics to the PyTorch module."""
    h1 = jnp.maximum(x @ params["w1"].T + params["b1"], 0.0)
    h2 = jnp.maximum(h1 @ params["w2"].T + params["b2"], 0.0)
    return h2 @ params["w3"].T + params["b3"]


if __name__ == "__main__":
    key = jax.random.PRNGKey(0)
    k_params, k_x1, k_x2 = jax.random.split(key, 3)

    params = init_params(k_params)
    packed = pack_params(params)

    # Small demo batch (batch=8, features=7).
    x = jax.random.normal(k_x1, (8, IN_F), dtype=jnp.float32)
    out = jax.block_until_ready(mood_predictor(x, packed))
    ref = reference_forward(x, params)
    assert out.shape == (8, 1)
    assert jnp.allclose(out, ref, atol=1e-4, rtol=1e-4), "mismatch vs reference (small)"

    # Exercise the multi-tile + ragged-last-block path.
    x2 = jax.random.normal(k_x2, (1000, IN_F), dtype=jnp.float32)
    out2 = jax.block_until_ready(mood_predictor(x2, packed))
    ref2 = reference_forward(x2, params)
    assert out2.shape == (1000, 1)
    assert jnp.allclose(out2, ref2, atol=1e-4, rtol=1e-4), "mismatch vs reference (ragged)"

    print("KERNEL_OK")
</pallas_src>

<mosaic_0001>
module attributes {stable_mosaic.version = 11 : i64} {
  func.func @mood_predictor_kernel(%arg0: i32, %arg1: memref<1x112xf32, #tpu.memory_space<vmem>>, %arg2: memref<112x160xf32, #tpu.memory_space<vmem>>, %arg3: memref<1x160xf32, #tpu.memory_space<vmem>>, %arg4: memref<160x160xf32, #tpu.memory_space<vmem>>, %arg5: memref<1x160xf32, #tpu.memory_space<vmem>>, %arg6: memref<160x16xf32, #tpu.memory_space<vmem>>, %arg7: memref<1x16xf32, #tpu.memory_space<vmem>>, %arg8: memref<1x16xf32, #tpu.memory_space<vmem>>) attributes {dimension_semantics = [#tpu.dimension_semantics<parallel>], iteration_bounds = array<i64: 1>, scalar_prefetch = 0 : i64, scratch_operands = 0 : i64, tpu.core_type = #tpu.core_type<tc>, window_params = [{transform_indices = @transform_0, window_bounds = array<i64: 1, 112>}, {pipeline_mode = #tpu.pipeline_mode<synchronous>, transform_indices = @transform_1, window_bounds = array<i64: 112, 160>}, {pipeline_mode = #tpu.pipeline_mode<synchronous>, transform_indices = @transform_2, window_bounds = array<i64: 1, 160>}, {pipeline_mode = #tpu.pipeline_mode<synchronous>, transform_indices = @transform_3, window_bounds = array<i64: 160, 160>}, {pipeline_mode = #tpu.pipeline_mode<synchronous>, transform_indices = @transform_4, window_bounds = array<i64: 1, 160>}, {pipeline_mode = #tpu.pipeline_mode<synchronous>, transform_indices = @transform_5, window_bounds = array<i64: 160, 16>}, {pipeline_mode = #tpu.pipeline_mode<synchronous>, transform_indices = @transform_6, window_bounds = array<i64: 1, 16>}, {transform_indices = @transform_7, window_bounds = array<i64: 1, 16>}]} {
    %c0 = arith.constant 0 : index
    %c0_0 = arith.constant 0 : index
    %0 = vector.load %arg1[%c0, %c0_0] : memref<1x112xf32, #tpu.memory_space<vmem>>, vector<1x112xf32>
    %c0_1 = arith.constant 0 : index
    %c0_2 = arith.constant 0 : index
    %1 = vector.load %arg2[%c0_1, %c0_2] : memref<112x160xf32, #tpu.memory_space<vmem>>, vector<112x160xf32>
    %cst = arith.constant dense<0.000000e+00> : vector<1x160xf32>
    %2 = tpu.matmul %0, %1, %cst {dimension_numbers = #tpu.dot_dimension_numbers<[1], [0], [0], [1], [0, 0, 1, 1], [], []>} : vector<1x112xf32>, vector<112x160xf32>, vector<1x160xf32> -> vector<1x160xf32>
    %c0_3 = arith.constant 0 : index
    %c0_4 = arith.constant 0 : index
    %3 = vector.load %arg3[%c0_3, %c0_4] : memref<1x160xf32, #tpu.memory_space<vmem>>, vector<1x160xf32>
    %4 = arith.addf %2, %3 : vector<1x160xf32>
    %cst_5 = arith.constant 0.000000e+00 : f32
    %5 = vector.broadcast %cst_5 : f32 to vector<1x160xf32>
    %6 = arith.maximumf %4, %5 : vector<1x160xf32>
    %c0_6 = arith.constant 0 : index
    %c0_7 = arith.constant 0 : index
    %7 = vector.load %arg4[%c0_6, %c0_7] : memref<160x160xf32, #tpu.memory_space<vmem>>, vector<160x160xf32>
    %cst_8 = arith.constant dense<0.000000e+00> : vector<1x160xf32>
    %8 = tpu.matmul %6, %7, %cst_8 {dimension_numbers = #tpu.dot_dimension_numbers<[1], [0], [0], [1], [0, 0, 1, 1], [], []>} : vector<1x160xf32>, vector<160x160xf32>, vector<1x160xf32> -> vector<1x160xf32>
    %c0_9 = arith.constant 0 : index
    %c0_10 = arith.constant 0 : index
    %9 = vector.load %arg5[%c0_9, %c0_10] : memref<1x160xf32, #tpu.memory_space<vmem>>, vector<1x160xf32>
    %10 = arith.addf %8, %9 : vector<1x160xf32>
    %cst_11 = arith.constant 0.000000e+00 : f32
    %11 = vector.broadcast %cst_11 : f32 to vector<1x160xf32>
    %12 = arith.maximumf %10, %11 : vector<1x160xf32>
    %c0_12 = arith.constant 0 : index
    %c0_13 = arith.constant 0 : index
    %13 = vector.load %arg6[%c0_12, %c0_13] : memref<160x16xf32, #tpu.memory_space<vmem>>, vector<160x16xf32>
    %cst_14 = arith.constant dense<0.000000e+00> : vector<1x16xf32>
    %14 = tpu.matmul %12, %13, %cst_14 {dimension_numbers = #tpu.dot_dimension_numbers<[1], [0], [0], [1], [0, 0, 1, 1], [], []>} : vector<1x160xf32>, vector<160x16xf32>, vector<1x16xf32> -> vector<1x16xf32>
    %c0_15 = arith.constant 0 : index
    %c0_16 = arith.constant 0 : index
    %15 = vector.load %arg7[%c0_15, %c0_16] : memref<1x16xf32, #tpu.memory_space<vmem>>, vector<1x16xf32>
    %16 = arith.addf %14, %15 : vector<1x16xf32>
    %c0_17 = arith.constant 0 : index
    %c0_18 = arith.constant 0 : index
    %17 = vector.load %arg8[%c0_17, %c0_18] : memref<1x16xf32, #tpu.memory_space<vmem>>, vector<1x16xf32>
    tpu.vector_store %arg8[%c0_17, %c0_18], %16 {strides = array<i32>} : memref<1x16xf32, #tpu.memory_space<vmem>>, vector<1x16xf32>,
    return
  }
  func.func @transform_0(%arg0: i32) -> (i32, i32) {
    %c0_i32 = arith.constant 0 : i32
    %c0_i32_0 = arith.constant 0 : i32
    return %arg0, %c0_i32 : i32, i32
  }
  func.func @transform_1(%arg0: i32) -> (i32, i32) {
    %c0_i32 = arith.constant 0 : i32
    %c0_i32_0 = arith.constant 0 : i32
    %c0_i32_1 = arith.constant 0 : i32
    return %c0_i32, %c0_i32_0 : i32, i32
  }
  func.func @transform_2(%arg0: i32) -> (i32, i32) {
    %c0_i32 = arith.constant 0 : i32
    %c0_i32_0 = arith.constant 0 : i32
    %c0_i32_1 = arith.constant 0 : i32
    return %c0_i32, %c0_i32_0 : i32, i32
  }
  func.func @transform_3(%arg0: i32) -> (i32, i32) {
    %c0_i32 = arith.constant 0 : i32
    %c0_i32_0 = arith.constant 0 : i32
    %c0_i32_1 = arith.constant 0 : i32
    return %c0_i32, %c0_i32_0 : i32, i32
  }
  func.func @transform_4(%arg0: i32) -> (i32, i32) {
    %c0_i32 = arith.constant 0 : i32
    %c0_i32_0 = arith.constant 0 : i32
    %c0_i32_1 = arith.constant 0 : i32
    return %c0_i32, %c0_i32_0 : i32, i32
  }
  func.func @transform_5(%arg0: i32) -> (i32, i32) {
    %c0_i32 = arith.constant 0 : i32
    %c0_i32_0 = arith.constant 0 : i32
    %c0_i32_1 = arith.constant 0 : i32
    return %c0_i32, %c0_i32_0 : i32, i32
  }
  func.func @transform_6(%arg0: i32) -> (i32, i32) {
    %c0_i32 = arith.constant 0 : i32
    %c0_i32_0 = arith.constant 0 : i32
    %c0_i32_1 = arith.constant 0 : i32
    return %c0_i32, %c0_i32_0 : i32, i32
  }
  func.func @transform_7(%arg0: i32) -> (i32, i32) {
    %c0_i32 = arith.constant 0 : i32
    %c0_i32_0 = arith.constant 0 : i32
    return %arg0, %c0_i32 : i32, i32
  }
}

</mosaic_0001>

<bundles_post_ra>
// kernel: tpu_custom_call.1
= control target key start
LH: loop header
LB: loop body
LE: loop exit
PB: predicated region body
PF: predicated region fallthrough
CT: control target
= control target key end

     0   :  { %s677_s0 = inlined_call_operand.vmem [shape: f32[1,112], index: 0, kind: input, shape index: {}]   ;;  %s678_s1 = inlined_call_operand.vmem [shape: f32[112,160], index: 1, kind: input, shape index: {}]   ;;  %s679_s2 = inlined_call_operand.vmem [shape: f32[1,160], index: 2, kind: input, shape index: {}]   ;;  %s680_s3 = inlined_call_operand.vmem [shape: f32[160,160], index: 3, kind: input, shape index: {}]   ;;  %s681_s4 = inlined_call_operand.vmem [shape: f32[1,160], index: 4, kind: input, shape index: {}]   ;;  %s682_s5 = inlined_call_operand.vmem [shape: f32[160,16], index: 5, kind: input, shape index: {}]   ;;  %s683_s6 = inlined_call_operand.vmem [shape: f32[1,16], index: 6, kind: input, shape index: {}]   ;;  %s684_s7 = inlined_call_operand.hbm [shape: f32[1,16], index: 7, kind: output, shape index: {}]  }
   0x1   :  { %v54_v0 = vld [vmem:[%s678_s1 + $0xd0] sm:$0xff]  ;;  %v55_v1 = vld [vmem:[%s678_s1 + $0xd8] sm:$0xff]  ;;  %v52_v2 = vld [vmem:[%s678_s1 + $0xc0] sm:$0xff] }
   0x2   :  { %68 = vmatpush.msra.mxu0 %v54_v0  ;;  %88 = vmatpush.msra.mxu1 %v55_v1  ;;  %v53_v3 = vld [vmem:[%s678_s1 + $0xc8] sm:$0xff]  ;;  %v50_v4 = vld [vmem:[%s678_s1 + $0xb0] sm:$0xff]  ;;  %v51_v5 = vld [vmem:[%s678_s1 + $0xb8] sm:$0xff] }
   0x3   :  { %v48_v6 = vld [vmem:[%s678_s1 + $0xa0] sm:$0xff]  ;;  %v49_v7 = vld [vmem:[%s678_s1 + $0xa8] sm:$0xff]  ;;  %v46_v8 = vld [vmem:[%s678_s1 + $0x90] sm:$0xff] }
   0x4   :  { %69 = vmatpush.msra.mxu0 %v52_v2  ;;  %89 = vmatpush.msra.mxu1 %v53_v3  ;;  %v47_v9 = vld [vmem:[%s678_s1 + $0x98] sm:$0xff]  ;;  %v44_v10 = vld [vmem:[%s678_s1 + $0x80] sm:$0xff]  ;;  %v45_v11 = vld [vmem:[%s678_s1 + $0x88] sm:$0xff] }
   0x5   :  { %v42_v12 = vld [vmem:[%s678_s1 + $0x70] sm:$0xff]  ;;  %v43_v14 = vld [vmem:[%s678_s1 + $0x78] sm:$0xff]  ;;  %v136_v16 = vld [vmem:[%s680_s3 + $0xe0] sm:$0xff] }
   0x6   :  { %70 = vmatpush.msra.mxu0 %v50_v4  ;;  %90 = vmatpush.msra.mxu1 %v51_v5  ;;  %v138_v13 = vld [vmem:[%s680_s3 + $0xf0] sm:$0xff]  ;;  %v144_v17 = vld [vmem:[%s680_s3 + $0x120] sm:$0xff]  ;;  %v41_v20 = vld [vmem:[%s678_s1 + $0x68] sm:$0xff] }
   0x7   :  { %158 = vmatpush.msra.mxu2 %v138_v13  ;;  %v146_v15 = vld [vmem:[%s680_s3 + $0x130] sm:$0xff]  ;;  %v40_v19 = vld [vmem:[%s678_s1 + $0x60] sm:$0xff]  ;;  %v39_v24 = vld [vmem:[%s678_s1 + $0x58] sm:$0xff] }
   0x8   :  { %71 = vmatpush.msra.mxu0 %v48_v6  ;;  %91 = vmatpush.msra.mxu1 %v49_v7  ;;  %v134_v18 = vld [vmem:[%s680_s3 + $0xd0] sm:$0xff]  ;;  %v132_v22 = vld [vmem:[%s680_s3 + $0xc0] sm:$0xff]  ;;  %v37_v28 = vld [vmem:[%s678_s1 + $0x48] sm:$0xff] }
   0x9   :  { %190 = vmatpush.msra.mxu3 %v146_v15  ;;  %159 = vmatpush.msra.mxu2 %v136_v16  ;;  %v142_v21 = vld [vmem:[%s680_s3 + $0x110] sm:$0xff]  ;;  %v140_v25 = vld [vmem:[%s680_s3 + $0x100] sm:$0xff]  ;;  %v139_v29 = vld [vmem:[%s680_s3 + $0xf8] sm:$0xff] }
   0xa   :  { %72 = vmatpush.msra.mxu0 %v46_v8  ;;  %92 = vmatpush.msra.mxu1 %v47_v9  ;;  %v38_v23 = vld [vmem:[%s678_s1 + $0x50] sm:$0xff]  ;;  %v36_v27 = vld [vmem:[%s678_s1 + $0x40] sm:$0xff]  ;;  %v35_v32 = vld [vmem:[%s678_s1 + $0x38] sm:$0xff] }
   0xb   :  { %191 = vmatpush.msra.mxu3 %v144_v17  ;;  %160 = vmatpush.msra.mxu2 %v134_v18  ;;  %v130_v26 = vld [vmem:[%s680_s3 + $0xb0] sm:$0xff]  ;;  %v128_v30 = vld [vmem:[%s680_s3 + $0xa0] sm:$0xff]  ;;  %v137_v33 = vld [vmem:[%s680_s3 + $0xe8] sm:$0xff] }
   0xc   :  { %73 = vmatpush.msra.mxu0 %v44_v10  ;;  %93 = vmatpush.msra.mxu1 %v45_v11  ;;  %v34_v31 = vld [vmem:[%s678_s1 + $0x30] sm:$0xff] }
   0xd   :  { %192 = vmatpush.msra.mxu3 %v142_v21  ;;  %161 = vmatpush.msra.mxu2 %v132_v22  ;;  %v126_v34 = vld [vmem:[%s680_s3 + $0x90] sm:$0xff] }
   0xe   :  { %74 = vmatpush.msra.mxu0 %v42_v12  ;;  %94 = vmatpush.msra.mxu1 %v43_v14 }
   0xf   :  { %193 = vmatpush.msra.mxu3 %v140_v25  ;;  %162 = vmatpush.msra.mxu2 %v130_v26 }
  0x10   :  { %75 = vmatpush.msra.mxu0 %v40_v19  ;;  %95 = vmatpush.msra.mxu1 %v41_v20 }
  0x12   :  { %76 = vmatpush.msra.mxu0 %v38_v23  ;;  %96 = vmatpush.msra.mxu1 %v39_v24 }
  0x14   :  { %77 = vmatpush.msra.mxu0 %v36_v27  ;;  %97 = vmatpush.msra.mxu1 %v37_v28 }
  0x15   :  { %12 = vsyncpa [#allocation3], 0  ;;  %v32_v35 = vld [vmem:[%s678_s1 + $0x20] sm:$0xff]  ;;  %v33_v36 = vld [vmem:[%s678_s1 + $0x28] sm:$0xff]  ;;  %198 = vmatpush.msrb.mxu3 %v139_v29  ;;  %163 = vmatpush.msra.mxu2 %v128_v30  ;;  %vm62_vm0 = vcmask 916480   ;;  %vm154_vm1 = vcmask 261120  }
  0x16   :  { %78 = vmatpush.msra.mxu0 %v34_v31  ;;  %98 = vmatpush.msra.mxu1 %v35_v32  ;;  %v135_v37 = vld [vmem:[%s680_s3 + $0xd8] sm:$0xff]  ;;  %v124_v38 = vld [vmem:[%s680_s3 + $0x80] sm:$0xff]  ;;  %v30_v39 = vld [vmem:[%s678_s1 + $0x10] sm:$0xff]  ;;  %s313_s14 = sshll.u32 %s684_s7, 4  ;;  %vm304_vm2 = vcmask 122880   ;;  %s314_s14 = int_to_ptr.hbm [resolvable:$true] %s313_s14 }
  0x17   :  { %v31_v40 = vld [vmem:[%s678_s1 + $0x18] sm:$0xff]  ;;  %199 = vmatpush.msrb.mxu3 %v137_v33  ;;  %164 = vmatpush.msra.mxu2 %v126_v34  ;;  %v133_v41 = vld [vmem:[%s680_s3 + $0xc8] sm:$0xff]  ;;  %v122_v42 = vld [vmem:[%s680_s3 + $0x70] sm:$0xff] }
  0x18   :  { %79 = vmatpush.msra.mxu0 %v32_v35  ;;  %99 = vmatpush.msra.mxu1 %v33_v36  ;;  %v28_v43 = vld [vmem:[%s678_s1] sm:$0xff]  ;;  %v29_v44 = vld [vmem:[%s678_s1 + $0x8] sm:$0xff]  ;;  %v131_v46 = vld [vmem:[%s680_s3 + $0xb8] sm:$0xff] }
  0x19   :  { %200 = vmatpush.msrb.mxu3 %v135_v37  ;;  %165 = vmatpush.msra.mxu2 %v124_v38  ;;  %v27_v45 = vld [vmem:[%s677_s0] sm:$0x1]  ;;  %v147_v48 = vld [vmem:[%s680_s3 + $0x138] sm:$0xff]  ;;  %v129_v49 = vld [vmem:[%s680_s3 + $0xa8] sm:$0xff] }
  0x1a   :  { %80 = vmatpush.msra.mxu0 %v30_v39  ;;  %100 = vmatpush.msra.mxu1 %v31_v40  ;;  %v120_v47 = vld [vmem:[%s680_s3 + $0x60] sm:$0xff]  ;;  %v118_v50 = vld [vmem:[%s680_s3 + $0x50] sm:$0xff]  ;;  %v127_v51 = vld [vmem:[%s680_s3 + $0x98] sm:$0xff] }
  0x1b   :  { %201 = vmatpush.msrb.mxu3 %v133_v41  ;;  %166 = vmatpush.msra.mxu2 %v122_v42  ;;  %v116_v52 = vld [vmem:[%s680_s3 + $0x40] sm:$0xff]  ;;  %v125_v53 = vld [vmem:[%s680_s3 + $0x88] sm:$0xff]  ;;  %v114_v54 = vld [vmem:[%s680_s3 + $0x30] sm:$0xff] }
  0x1c   :  { %81 = vmatpush.msra.mxu0 %v28_v43  ;;  %101 = vmatpush.msra.mxu1 %v29_v44  ;;  %v123_v55 = vld [vmem:[%s680_s3 + $0x78] sm:$0xff]  ;;  %v112_v56 = vld [vmem:[%s680_s3 + $0x20] sm:$0xff]  ;;  %v121_v57 = vld [vmem:[%s680_s3 + $0x68] sm:$0xff] }
  0x1d   :  { %322 = vmatmul.msk.f32.vlgmr.msra.gmra.mxu0 %vm62_vm0, %v27_v45  ;;  %323 = vmatmul.msk.f32.vlgmr.msra.gmra.mxu1 %vm62_vm0, %v27_v45  ;;  %v145_v58 = vld [vmem:[%s680_s3 + $0x128] sm:$0xff]  ;;  %v110_v59 = vld [vmem:[%s680_s3 + $0x10] sm:$0xff]  ;;  %v119_v60 = vld [vmem:[%s680_s3 + $0x58] sm:$0xff] }
  0x1e   :  { %202 = vmatpush.msrb.mxu3 %v131_v46  ;;  %167 = vmatpush.msra.mxu2 %v120_v47  ;;  %v143_v61 = vld [vmem:[%s680_s3 + $0x118] sm:$0xff]  ;;  %v108_v62 = vld [vmem:[%s680_s3] sm:$0xff]  ;;  %v117_v63 = vld [vmem:[%s680_s3 + $0x48] sm:$0xff] }
  0x1f   :  { %230 = vmatpush.msrb.mxu0 %v147_v48  ;;  %v141_v0 = vld [vmem:[%s680_s3 + $0x108] sm:$0xff]  ;;  %v115_v1 = vld [vmem:[%s680_s3 + $0x38] sm:$0xff]  ;;  %v254_v6 = vld [vmem:[%s682_s5 + $0x70] sm:$0xff] }
  0x20   :  { %203 = vmatpush.msrb.mxu3 %v129_v49  ;;  %168 = vmatpush.msra.mxu2 %v118_v50  ;;  %v113_v2 = vld [vmem:[%s680_s3 + $0x28] sm:$0xff]  ;;  %v111_v3 = vld [vmem:[%s680_s3 + $0x18] sm:$0xff]  ;;  %v252_v8 = vld [vmem:[%s682_s5 + $0x60] sm:$0xff] }
  0x21   :  { %231 = vmatpush.msrb.mxu0 %v145_v58  ;;  %v109_v4 = vld [vmem:[%s680_s3 + $0x8] sm:$0xff]  ;;  %v255_v5 = vld [vmem:[%s682_s5 + $0x78] sm:$0xff]  ;;  %v250_v10 = vld [vmem:[%s682_s5 + $0x50] sm:$0xff] }
  0x22   :  { %204 = vmatpush.msrb.mxu3 %v127_v51  ;;  %169 = vmatpush.msra.mxu2 %v116_v52  ;;  %v253_v7 = vld [vmem:[%s682_s5 + $0x68] sm:$0xff]  ;;  %v251_v9 = vld [vmem:[%s682_s5 + $0x58] sm:$0xff]  ;;  %v248_v12 = vld [vmem:[%s682_s5 + $0x40] sm:$0xff] }
  0x23   :  { %232 = vmatpush.msrb.mxu0 %v143_v61  ;;  %264 = vmatpush.msrb.mxu1 %v255_v5  ;;  %v249_v11 = vld [vmem:[%s682_s5 + $0x48] sm:$0xff]  ;;  %v56_v13 = vld [vmem:[%s679_s2] sm:$0x3]  ;;  %v247_v14 = vld [vmem:[%s682_s5 + $0x38] sm:$0xff] }
  0x24   :  { %205 = vmatpush.msrb.mxu3 %v125_v53  ;;  %170 = vmatpush.msra.mxu2 %v114_v54  ;;  %v58_v15 = vperm.slane %v56_v13, 0  ;;  %v59_v16 = vperm.slane %v56_v13, 1  ;;  %v246_v23 = vld [vmem:[%s682_s5 + $0x30] sm:$0xff]  ;;  %v245_v24 = vld [vmem:[%s682_s5 + $0x28] sm:$0xff]  ;;  %v244_v25 = vld [vmem:[%s682_s5 + $0x20] sm:$0xff] }
  0x25   :  { %233 = vmatpush.msrb.mxu0 %v141_v0  ;;  %265 = vmatpush.msrb.mxu1 %v254_v6  ;;  %v243_v26 = vld [vmem:[%s682_s5 + $0x18] sm:$0xff]  ;;  %v242_v27 = vld [vmem:[%s682_s5 + $0x10] sm:$0xff]  ;;  %v241_v28 = vld [vmem:[%s682_s5 + $0x8] sm:$0xff] }
  0x26   :  { %206 = vmatpush.msrb.mxu3 %v123_v55  ;;  %171 = vmatpush.msra.mxu2 %v112_v56  ;;  %v240_v29 = vld [vmem:[%s682_s5] sm:$0xff]  ;;  %v259_v30 = vld [vmem:[%s682_s5 + $0x98] sm:$0xff]  ;;  %v258_v31 = vld [vmem:[%s682_s5 + $0x90] sm:$0xff] }
  0x27   :  { %266 = vmatpush.msrb.mxu1 %v253_v7  ;;  %v257_v32 = vld [vmem:[%s682_s5 + $0x88] sm:$0xff]  ;;  %v256_v33 = vld [vmem:[%s682_s5 + $0x80] sm:$0xff] }
  0x28   :  { %207 = vmatpush.msrb.mxu3 %v121_v57  ;;  %172 = vmatpush.msra.mxu2 %v110_v59  ;;  %v148_v34 = vld [vmem:[%s681_s4] sm:$0x3]  ;;  %s354_s4 = smov [#allocation2]  }
  0x29   :  { %267 = vmatpush.msrb.mxu1 %v252_v8  ;;  %v150_v35 = vperm.slane %v148_v34, 0  ;;  %v151_v41 = vperm.slane %v148_v34, 1  ;;  %v260_v47 = vld [vmem:[%s683_s6] sm:$0x1]  ;;  %s311_s12 = sshll.u32 %s354_s4, 4  ;;  %s312_s12 = int_to_ptr.vmem [resolvable:$true] %s311_s12 }
  0x2a   :  { %208 = vmatpush.msrb.mxu3 %v119_v60  ;;  %173 = vmatpush.msra.mxu2 %v108_v62 }
  0x2b   :  { %268 = vmatpush.msrb.mxu1 %v251_v9 }
  0x2c   :  { %209 = vmatpush.msrb.mxu3 %v117_v63  ;;  %296 = vmatpush.msrb.mxu2 %v259_v30 }
  0x2d   :  { %269 = vmatpush.msrb.mxu1 %v250_v10 }
  0x2e   :  { %210 = vmatpush.msrb.mxu3 %v115_v1  ;;  %297 = vmatpush.msrb.mxu2 %v258_v31 }
  0x2f   :  { %270 = vmatpush.msrb.mxu1 %v249_v11 }
  0x30   :  { %211 = vmatpush.msrb.mxu3 %v113_v2  ;;  %298 = vmatpush.msrb.mxu2 %v257_v32 }
  0x31   :  { %271 = vmatpush.msrb.mxu1 %v248_v12 }
  0x32   :  { %212 = vmatpush.msrb.mxu3 %v111_v3  ;;  %299 = vmatpush.msrb.mxu2 %v256_v33 }
  0x33   :  { %272 = vmatpush.msrb.mxu1 %v247_v14 }
  0x34   :  { %213 = vmatpush.msrb.mxu3 %v109_v4 }
  0x35   :  { %273 = vmatpush.msrb.mxu1 %v246_v23 }
  0x37   :  { %274 = vmatpush.msrb.mxu1 %v245_v24 }
  0x39   :  { %275 = vmatpush.msrb.mxu1 %v244_v25 }
  0x3b   :  { %276 = vmatpush.msrb.mxu1 %v243_v26 }
  0x3d   :  { %277 = vmatpush.msrb.mxu1 %v242_v27 }
  0x3f   :  { %278 = vmatpush.msrb.mxu1 %v241_v28 }
  0x41   :  { %279 = vmatpush.msrb.mxu1 %v240_v29 }
  0x9a   :  { %v83_v17 = vpop.f32.mrf.mxu0  ;;  %v103_v18 = vpop.f32.mrf.mxu1 }
  0x9b   :  { %v84_v19 = vadd.f32 %v83_v17, %v58_v15  ;;  %v104_v20 = vadd.f32 %v103_v18, %v59_v16 }
  0x9d   :  { %v106_v21 = vmax.f32 %v84_v19, 0.0  ;;  %v107_v22 = vmax.f32 %v104_v20, 0.0 }
  0x9f   :  { %174 = vmatmul.f32.vlgmr.msra.gmra.mxu2 %v106_v21  ;;  %324 = vmatmul.msk.f32.vlgmr.msra.gmra.mxu3 %vm154_vm1, %v107_v22 }
  0xa0   :  { %325 = vmatmul.msk.f32.vlgmr.msrb.gmra.mxu0 %vm154_vm1, %v107_v22 }
  0xa7   :  { %214 = vmatmul.f32.vlgmr.msrb.gmra.mxu3 %v106_v21 }
 0x11d   :  { %v235_v44 = vpop.f32.mrf.mxu0 }
 0x122   :  { %v175_v36 = vpop.f32.mrf.mxu2  ;;  %v195_v37 = vpop.f32.mrf.mxu3 }
 0x123   :  { %v176_v38 = vadd.f32 %v175_v36, %v150_v35 }
 0x125   :  { %v196_v39 = vadd.f32 %v195_v37, %v176_v38 }
 0x127   :  { %v238_v40 = vmax.f32 %v196_v39, 0.0 }
 0x129   :  { %280 = vmatmul.f32.vlgmr.msrb.gmra.mxu1 %v238_v40 }
 0x12a   :  { %v215_v42 = vpop.f32.mrf.mxu3 }
 0x12b   :  { %v216_v43 = vadd.f32 %v215_v42, %v151_v41 }
 0x12d   :  { %v236_v45 = vadd.f32 %v235_v44, %v216_v43 }
 0x12f   :  { %v239_v46 = vmax.f32 %v236_v45, 0.0 }
 0x131   :  { %326 = vmatmul.msk.f32.vlgmr.msrb.gmra.mxu2 %vm154_vm1, %v239_v46 }
 0x1a6   :  { %v281_v48 = vpop.f32.mrf.mxu1 }
 0x1a7   :  { %v282_v49 = vadd.f32 %v281_v48, %v260_v47 }
 0x1b4   :  { %v301_v50 = vpop.f32.mrf.mxu2 }
 0x1b5   :  { %v302_v51 = vadd.f32 %v301_v50, %v282_v49 }
 0x1b7   :  { %305 = vst.msk [vmem:[#allocation2] sm:$0x1] %vm304_vm2, %v302_v51 }
 0x1b8   :  { %316 = dma.vmem_to_hbm [thread:$0]  %s312_s12, 16, %s314_s14, [#allocation3]  }
 0x1b9   :  { %352 = dma.done.wait [#allocation3], 16  }
 0x1ba   :  { %353 = vsyncadd [#allocation3], 4294967280 }
 0x1bb   :  { %321 = vsyncpa [#allocation3], 1 }

</bundles_post_ra>
